<compile_context>
chip_gen: v5e
topology: v5e:2x2
jax: 0.10.0
libtpu: 0.0.40
codegen_flags: <defaults>
</compile_context>

<pallas_src>
import functools

import jax
import jax.numpy as jnp
from jax.experimental import pallas as pl
from jax.experimental.pallas import tpu as pltpu

BN_EPS = 1e-5
LANE = 128  # lane width; 256 would fill v6e/v7x MXU tiles better for big
            # layers but doubles padding waste at these small sizes.


# ---------------------------------------------------------------------------
# Fused kernel (layer loop unrolled at trace time; weights streamed via DMA)
# ---------------------------------------------------------------------------
def _make_fused_mlp_kernel(n_hidden, kdims, ndims):
    n_layers = n_hidden + 1

    def kernel(*refs):
        # refs: x, W_0..W_{L-1} (HBM), gamma_all, beta_all, b_last, out,
        #       weight double-buffer scratch, DMA semaphores
        x_ref = refs[0]
        w_hbm = refs[1:1 + n_layers]
        gam_ref = refs[1 + n_layers]          # (n_hidden, Hmax) f32
        bet_ref = refs[2 + n_layers]          # (n_hidden, Hmax) f32
        b_last_ref = refs[3 + n_layers]       # (1, Np_last)     f32
        o_ref = refs[4 + n_layers]            # (B, Np_last)     f32
        wbuf = refs[5 + n_layers]             # (2, Kmax, Nmax)  bf16 scratch
        sem = refs[6 + n_layers]              # DMA sems (2,)

        def w_dma(i, slot):
            return pltpu.make_async_copy(
                w_hbm[i], wbuf.at[slot, :kdims[i], :ndims[i]], sem.at[slot])

        # Prime the weight-streaming pipeline.
        w_dma(0, 0).start()

        x = x_ref[...]                        # (B, D0p) bf16 — stays bf16
        for i in range(n_layers):
            slot = i & 1
            w_dma(i, slot).wait()
            if i + 1 < n_layers:
                # Prefetch next layer's weight while this layer computes.
                w_dma(i + 1, 1 - slot).start()

            w = wbuf[slot, :kdims[i], :ndims[i]]                  # bf16
            y = jnp.dot(x, w, preferred_element_type=jnp.float32)  # f32 acc

            if i < n_hidden:
                # Hidden Linear bias omitted: training-mode BN subtracts the
                # batch mean, so a constant per-feature bias cancels exactly.
                mean = jnp.mean(y, axis=0, keepdims=True)
                c = y - mean                                # two-pass variance
                var = jnp.mean(c * c, axis=0, keepdims=True)
                gamma = gam_ref[i:i + 1, :ndims[i]]
                beta = bet_ref[i:i + 1, :ndims[i]]
                scale = gamma * jax.lax.rsqrt(var + BN_EPS)
                # BN + relu, back to bf16 for the next MXU pass.
                x = jnp.maximum(c * scale + beta, 0.0).astype(jnp.bfloat16)
                # dropout_p == 0.0 -> identity
            else:
                o_ref[...] = y + b_last_ref[...]

    return kernel


# ---------------------------------------------------------------------------
# Helpers
# ---------------------------------------------------------------------------
def _round_up(n, m):
    return ((n + m - 1) // m) * m


def _pad2d(a, rows, cols):
    r, c = a.shape
    return jnp.pad(a, ((0, rows - r), (0, cols - c)))


def _full_spec(shape):
    return pl.BlockSpec(shape, lambda: (0,) * len(shape))


def _vmem_limit_bytes(batch, pdims, n_hidden):
    """Footprint-derived VMEM budget, capped by the chip's physical VMEM."""
    kmax, nmax = max(pdims[:-1]), max(pdims[1:])
    hmax = max(pdims[1:])
    need = 2 * kmax * nmax * 2            # double-buffered weight scratch (bf16)
    need += batch * pdims[0] * 2          # x block (bf16)
    need += batch * pdims[-1] * 4         # out block (f32)
    need += 2 * n_hidden * hmax * 4       # gamma/beta stacks
    need += pdims[-1] * 4                 # b_last
    need += 3 * batch * hmax * 4          # live y (f32) + activation temporaries
    need = 2 * need + (4 << 20)           # compiler temporaries / headroom
    try:  # physical VMEM: 128 MiB on v5e/v6e, 64 MiB per TC on v7x
        phys = int(getattr(pltpu.get_tpu_info(), "vmem_capacity_bytes", 64 << 20))
    except Exception:
        phys = 64 << 20
    return int(min(max(need, 16 << 20), int(phys * 0.85)))


# ---------------------------------------------------------------------------
# One-time parameter preparation (pad + cast OUTSIDE the per-call path)
# ---------------------------------------------------------------------------
def prepare_mlp_params(params):
    """Pad params to lane multiples, cast weights to bf16, stack BN params."""
    weights, biases = params["weights"], params["biases"]
    gammas, betas = params["gammas"], params["betas"]
    n_layers = len(weights)
    n_hidden = n_layers - 1

    dims = [weights[0].shape[0]] + [w.shape[1] for w in weights]
    pdims = [_round_up(d, LANE) for d in dims]

    w_p = [_pad2d(weights[i], pdims[i], pdims[i + 1]).astype(jnp.bfloat16)
           for i in range(n_layers)]
    hmax = max(pdims[1:-1], default=LANE)
    gam_p = jnp.zeros((max(n_hidden, 1), hmax), jnp.float32)
    bet_p = jnp.zeros((max(n_hidden, 1), hmax), jnp.float32)
    for i in range(n_hidden):
        gam_p = gam_p.at[i, :gammas[i].shape[1]].set(gammas[i][0])
        bet_p = bet_p.at[i, :betas[i].shape[1]].set(betas[i][0])
    b_last_p = _pad2d(biases[-1], 1, pdims[-1])
    # Hidden-layer biases intentionally not packed: they cancel inside the
    # kernel under training-mode BatchNorm.
    prepared = {"weights": w_p, "gammas": gam_p, "betas": bet_p,
                "b_last": b_last_p}
    return prepared, dims[-1]


# ---------------------------------------------------------------------------
# Forward pass: single pallas_call over the whole network
# ---------------------------------------------------------------------------
@functools.partial(jax.jit, static_argnames=("out_dim",))
def mlp_forward(x, prepared, *, out_dim):
    w_p = prepared["weights"]           # list[(Kp_i, Np_i) bf16]
    gam_p = prepared["gammas"]          # (n_hidden, Hmax) f32
    bet_p = prepared["betas"]           # (n_hidden, Hmax) f32
    b_last_p = prepared["b_last"]       # (1, Np_last) f32

    n_layers = len(w_p)
    n_hidden = n_layers - 1
    batch, in_dim = x.shape
    # Never pad/tile the batch axis: BN statistics are over the full batch.
    # (Multiples of 16 pack bf16 sublanes fully; 8 is the hard floor.)
    assert batch % 8 == 0, "batch must be a multiple of 8 (and is never padded)"

    pdims = [w_p[0].shape[0]] + [w.shape[1] for w in w_p]
    kdims, ndims = tuple(pdims[:-1]), tuple(pdims[1:])
    kmax, nmax = max(kdims), max(ndims)

    # x is cast to bf16 in the wrapper so the kernel's resident activation
    # dtype is bf16 end-to-end (accepted accuracy trade-off: bf16 MXU operands).
    x_p = _pad2d(x.astype(jnp.bfloat16), batch, pdims[0])

    flops = sum(2 * batch * kdims[i] * ndims[i] for i in range(n_layers))
    bytes_accessed = (int(x_p.size) * 2
                      + sum(int(w.size) * 2 for w in w_p)
                      + int(gam_p.size + bet_p.size + b_last_p.size) * 4
                      + batch * pdims[-1] * 4)
    cost = pl.CostEstimate(flops=flops,
                           transcendentals=sum(ndims[:n_hidden]),
                           bytes_accessed=bytes_accessed)

    args = [x_p] + list(w_p) + [gam_p, bet_p, b_last_p]
    in_specs = ([_full_spec(x_p.shape)]
                + [pl.BlockSpec(memory_space=pl.ANY)] * n_layers   # streamed
                + [_full_spec(gam_p.shape), _full_spec(bet_p.shape),
                   _full_spec(b_last_p.shape)])

    out_p = pl.pallas_call(
        _make_fused_mlp_kernel(n_hidden, kdims, ndims),
        out_shape=jax.ShapeDtypeStruct((batch, pdims[-1]), jnp.float32),
        in_specs=in_specs,
        out_specs=_full_spec((batch, pdims[-1])),
        scratch_shapes=[pltpu.VMEM((2, kmax, nmax), jnp.bfloat16),
                        pltpu.SemaphoreType.DMA((2,))],
        cost_estimate=cost,
        compiler_params=pltpu.CompilerParams(
            vmem_limit_bytes=_vmem_limit_bytes(batch, pdims, n_hidden)),
    )(*args)

    return out_p[:, :out_dim]


# ---------------------------------------------------------------------------
# Parameter construction (deterministic, mirrors MLP.__init__ shapes)
# ---------------------------------------------------------------------------
def init_mlp_params(key, input_size, hidden_sizes, output_size):
    if not isinstance(hidden_sizes, list):
        hidden_sizes = [hidden_sizes]
    layer_sizes = [input_size] + hidden_sizes + [output_size]

    params = {"weights": [], "biases": [], "gammas": [], "betas": []}
    for i in range(len(layer_sizes) - 1):
        fan_in, fan_out = layer_sizes[i], layer_sizes[i + 1]
        key, wk, bk = jax.random.split(key, 3)
        # xavier_uniform_ on PyTorch weight (out, in) -> stored transposed (in, out)
        limit = (6.0 / (fan_in + fan_out)) ** 0.5
        w = jax.random.uniform(wk, (fan_in, fan_out), jnp.float32, -limit, limit)
        # nn.Linear default bias init: U(-1/sqrt(fan_in), 1/sqrt(fan_in))
        blim = 1.0 / (fan_in ** 0.5)
        b = jax.random.uniform(bk, (1, fan_out), jnp.float32, -blim, blim)
        params["weights"].append(w)
        params["biases"].append(b)

    for h in hidden_sizes:
        params["gammas"].append(jnp.ones((1, h), jnp.float32))   # bn_init = ones_
        params["betas"].append(jnp.zeros((1, h), jnp.float32))   # BN bias default 0
    return params


# Pure-JAX f32 reference with exact PyTorch-module semantics (incl. hidden bias).
def mlp_reference(x, params):
    n_layers = len(params["weights"])
    for i in range(n_layers - 1):
        y = x @ params["weights"][i] + params["biases"][i]
        mean = jnp.mean(y, axis=0, keepdims=True)
        var = jnp.mean((y - mean) ** 2, axis=0, keepdims=True)
        y = (y - mean) / jnp.sqrt(var + BN_EPS)
        y = y * params["gammas"][i] + params["betas"][i]
        x = jnp.maximum(y, 0.0)
    return x @ params["weights"][-1] + params["biases"][-1]


if __name__ == "__main__":
    key = jax.random.PRNGKey(0)
    kx, kp = jax.random.split(key)

    batch = 8
    input_size = 16
    hidden_sizes = [32, 32]
    output_size = 8

    x = jax.random.normal(kx, (batch, input_size), jnp.float32)
    params = init_mlp_params(kp, input_size, hidden_sizes, output_size)

    # Pad + cast parameters ONCE, outside the per-call path.
    prepared, out_dim = prepare_mlp_params(params)

    out = mlp_forward(x, prepared, out_dim=out_dim)
    out = jax.block_until_ready(out)

    ref = mlp_reference(x, params)
    assert out.shape == (batch, output_size)
    # bf16 resident activations + bf16 MXU operands => compare at bf16-level
    # tolerance against the f32 reference.
    assert jnp.allclose(out, ref, atol=1e-1, rtol=5e-2), "mismatch vs reference"

    print("KERNEL_OK")
</pallas_src>

<mosaic_0001>
module attributes {stable_mosaic.version = 11 : i64} {
  func.func @kernel(%arg0: memref<8x128xbf16, #tpu.memory_space<vmem>>, %arg1: memref<128x128xbf16, #tpu.memory_space<any>>, %arg2: memref<128x128xbf16, #tpu.memory_space<any>>, %arg3: memref<128x128xbf16, #tpu.memory_space<any>>, %arg4: memref<2x128xf32, #tpu.memory_space<vmem>>, %arg5: memref<2x128xf32, #tpu.memory_space<vmem>>, %arg6: memref<1x128xf32, #tpu.memory_space<vmem>>, %arg7: memref<8x128xf32, #tpu.memory_space<vmem>>, %arg8: memref<2x128x128xbf16, #tpu.memory_space<vmem>>, %arg9: memref<2x!tpu.dma_semaphore, #tpu.memory_space<semaphore_mem>>) attributes {dimension_semantics = [], scalar_prefetch = 0 : i64, scratch_operands = 2 : i64, tpu.core_type = #tpu.core_type<tc>} {
    %c0_i32 = arith.constant 0 : i32
    %c0_i32_0 = arith.constant 0 : i32
    %c0_i32_1 = arith.constant 0 : i32
    %c0_i32_2 = arith.constant 0 : i32
    %0 = tpu.memref_slice %arg8[%c0_i32, %c0_i32_1, %c0_i32_2] : memref<2x128x128xbf16, #tpu.memory_space<vmem>> -> memref<1x128x128xbf16, #tpu.memory_space<vmem>>
    %1 = tpu.memref_squeeze %0 : memref<1x128x128xbf16, #tpu.memory_space<vmem>> -> memref<128x128xbf16, #tpu.memory_space<vmem>>
    %2 = tpu.memref_slice %arg9[%c0_i32_0] : memref<2x!tpu.dma_semaphore, #tpu.memory_space<semaphore_mem>> -> memref<1x!tpu.dma_semaphore, #tpu.memory_space<semaphore_mem>>
    %3 = tpu.memref_squeeze %2 : memref<1x!tpu.dma_semaphore, #tpu.memory_space<semaphore_mem>> -> memref<!tpu.dma_semaphore, #tpu.memory_space<semaphore_mem>>
    tpu.enqueue_dma source(%arg1 : memref<128x128xbf16, #tpu.memory_space<any>>) target(%1 : memref<128x128xbf16, #tpu.memory_space<vmem>>) target_semaphore(%3 : memref<!tpu.dma_semaphore, #tpu.memory_space<semaphore_mem>>)
    %c0 = arith.constant 0 : index
    %c0_3 = arith.constant 0 : index
    %4 = vector.load %arg0[%c0, %c0_3] : memref<8x128xbf16, #tpu.memory_space<vmem>>, vector<8x128xbf16>
    %c0_i32_4 = arith.constant 0 : i32
    %c0_i32_5 = arith.constant 0 : i32
    %c0_i32_6 = arith.constant 0 : i32
    %c0_i32_7 = arith.constant 0 : i32
    %5 = tpu.memref_slice %arg8[%c0_i32_4, %c0_i32_6, %c0_i32_7] : memref<2x128x128xbf16, #tpu.memory_space<vmem>> -> memref<1x128x128xbf16, #tpu.memory_space<vmem>>
    %6 = tpu.memref_squeeze %5 : memref<1x128x128xbf16, #tpu.memory_space<vmem>> -> memref<128x128xbf16, #tpu.memory_space<vmem>>
    %7 = tpu.memref_slice %arg9[%c0_i32_5] : memref<2x!tpu.dma_semaphore, #tpu.memory_space<semaphore_mem>> -> memref<1x!tpu.dma_semaphore, #tpu.memory_space<semaphore_mem>>
    %8 = tpu.memref_squeeze %7 : memref<1x!tpu.dma_semaphore, #tpu.memory_space<semaphore_mem>> -> memref<!tpu.dma_semaphore, #tpu.memory_space<semaphore_mem>>
    tpu.wait_dma2 semaphore(%8 : memref<!tpu.dma_semaphore, #tpu.memory_space<semaphore_mem>>) src(%arg1 : memref<128x128xbf16, #tpu.memory_space<any>>) dst(%6 : memref<128x128xbf16, #tpu.memory_space<vmem>>)
    %c1_i32 = arith.constant 1 : i32
    %c1_i32_8 = arith.constant 1 : i32
    %c0_i32_9 = arith.constant 0 : i32
    %c0_i32_10 = arith.constant 0 : i32
    %9 = tpu.memref_slice %arg8[%c1_i32, %c0_i32_9, %c0_i32_10] : memref<2x128x128xbf16, #tpu.memory_space<vmem>> -> memref<1x128x128xbf16, #tpu.memory_space<vmem>>
    %10 = tpu.memref_squeeze %9 : memref<1x128x128xbf16, #tpu.memory_space<vmem>> -> memref<128x128xbf16, #tpu.memory_space<vmem>>
    %11 = tpu.memref_slice %arg9[%c1_i32_8] : memref<2x!tpu.dma_semaphore, #tpu.memory_space<semaphore_mem>> -> memref<1x!tpu.dma_semaphore, #tpu.memory_space<semaphore_mem>>
    %12 = tpu.memref_squeeze %11 : memref<1x!tpu.dma_semaphore, #tpu.memory_space<semaphore_mem>> -> memref<!tpu.dma_semaphore, #tpu.memory_space<semaphore_mem>>
    tpu.enqueue_dma source(%arg2 : memref<128x128xbf16, #tpu.memory_space<any>>) target(%10 : memref<128x128xbf16, #tpu.memory_space<vmem>>) target_semaphore(%12 : memref<!tpu.dma_semaphore, #tpu.memory_space<semaphore_mem>>)
    %c0_11 = arith.constant 0 : index
    %c0_12 = arith.constant 0 : index
    %c0_13 = arith.constant 0 : index
    %13 = vector.load %arg8[%c0_11, %c0_12, %c0_13] : memref<2x128x128xbf16, #tpu.memory_space<vmem>>, vector<1x128x128xbf16>
    %14 = vector.shape_cast %13 : vector<1x128x128xbf16> to vector<128x128xbf16>
    %cst = arith.constant dense<0.000000e+00> : vector<8x128xf32>
    %15 = tpu.matmul %4, %14, %cst {dimension_numbers = #tpu.dot_dimension_numbers<[1], [0], [0], [1], [0, 0, 1, 1], [], []>} : vector<8x128xbf16>, vector<128x128xbf16>, vector<8x128xf32> -> vector<8x128xf32>
    %cst_14 = arith.constant dense<0.000000e+00> : vector<128xf32>
    %16 = vector.multi_reduction <add>, %15, %cst_14 [0] : vector<8x128xf32> to vector<128xf32>
    %17 = vector.shape_cast %16 : vector<128xf32> to vector<1x128xf32>
    %cst_15 = arith.constant 8.000000e+00 : f32
    %18 = vector.broadcast %cst_15 : f32 to vector<1x128xf32>
    %19 = arith.divf %17, %18 : vector<1x128xf32>
    %20 = vector.broadcast %19 : vector<1x128xf32> to vector<8x128xf32>
    %21 = arith.subf %15, %20 : vector<8x128xf32>
    %22 = arith.mulf %21, %21 : vector<8x128xf32>
    %cst_16 = arith.constant dense<0.000000e+00> : vector<128xf32>
    %23 = vector.multi_reduction <add>, %22, %cst_16 [0] : vector<8x128xf32> to vector<128xf32>
    %24 = vector.shape_cast %23 : vector<128xf32> to vector<1x128xf32>
    %cst_17 = arith.constant 8.000000e+00 : f32
    %25 = vector.broadcast %cst_17 : f32 to vector<1x128xf32>
    %26 = arith.divf %24, %25 : vector<1x128xf32>
    %c0_18 = arith.constant 0 : index
    %c0_19 = arith.constant 0 : index
    %27 = vector.load %arg4[%c0_18, %c0_19] : memref<2x128xf32, #tpu.memory_space<vmem>>, vector<1x128xf32>
    %c0_20 = arith.constant 0 : index
    %c0_21 = arith.constant 0 : index
    %28 = vector.load %arg5[%c0_20, %c0_21] : memref<2x128xf32, #tpu.memory_space<vmem>>, vector<1x128xf32>
    %cst_22 = arith.constant 9.99999974E-6 : f32
    %29 = vector.broadcast %cst_22 : f32 to vector<1x128xf32>
    %30 = arith.addf %26, %29 : vector<1x128xf32>
    %31 = math.rsqrt %30 : vector<1x128xf32>
    %32 = arith.mulf %27, %31 : vector<1x128xf32>
    %33 = vector.broadcast %32 : vector<1x128xf32> to vector<8x128xf32>
    %34 = arith.mulf %21, %33 : vector<8x128xf32>
    %35 = vector.broadcast %28 : vector<1x128xf32> to vector<8x128xf32>
    %36 = arith.addf %34, %35 : vector<8x128xf32>
    %cst_23 = arith.constant 0.000000e+00 : f32
    %37 = vector.broadcast %cst_23 : f32 to vector<8x128xf32>
    %38 = arith.maximumf %36, %37 : vector<8x128xf32>
    %39 = arith.truncf %38 : vector<8x128xf32> to vector<8x128xbf16>
    %c1_i32_24 = arith.constant 1 : i32
    %c1_i32_25 = arith.constant 1 : i32
    %c0_i32_26 = arith.constant 0 : i32
    %c0_i32_27 = arith.constant 0 : i32
    %40 = tpu.memref_slice %arg8[%c1_i32_24, %c0_i32_26, %c0_i32_27] : memref<2x128x128xbf16, #tpu.memory_space<vmem>> -> memref<1x128x128xbf16, #tpu.memory_space<vmem>>
    %41 = tpu.memref_squeeze %40 : memref<1x128x128xbf16, #tpu.memory_space<vmem>> -> memref<128x128xbf16, #tpu.memory_space<vmem>>
    %42 = tpu.memref_slice %arg9[%c1_i32_25] : memref<2x!tpu.dma_semaphore, #tpu.memory_space<semaphore_mem>> -> memref<1x!tpu.dma_semaphore, #tpu.memory_space<semaphore_mem>>
    %43 = tpu.memref_squeeze %42 : memref<1x!tpu.dma_semaphore, #tpu.memory_space<semaphore_mem>> -> memref<!tpu.dma_semaphore, #tpu.memory_space<semaphore_mem>>
    tpu.wait_dma2 semaphore(%43 : memref<!tpu.dma_semaphore, #tpu.memory_space<semaphore_mem>>) src(%arg2 : memref<128x128xbf16, #tpu.memory_space<any>>) dst(%41 : memref<128x128xbf16, #tpu.memory_space<vmem>>)
    %c0_i32_28 = arith.constant 0 : i32
    %c0_i32_29 = arith.constant 0 : i32
    %c0_i32_30 = arith.constant 0 : i32
    %c0_i32_31 = arith.constant 0 : i32
    %44 = tpu.memref_slice %arg8[%c0_i32_28, %c0_i32_30, %c0_i32_31] : memref<2x128x128xbf16, #tpu.memory_space<vmem>> -> memref<1x128x128xbf16, #tpu.memory_space<vmem>>
    %45 = tpu.memref_squeeze %44 : memref<1x128x128xbf16, #tpu.memory_space<vmem>> -> memref<128x128xbf16, #tpu.memory_space<vmem>>
    %46 = tpu.memref_slice %arg9[%c0_i32_29] : memref<2x!tpu.dma_semaphore, #tpu.memory_space<semaphore_mem>> -> memref<1x!tpu.dma_semaphore, #tpu.memory_space<semaphore_mem>>
    %47 = tpu.memref_squeeze %46 : memref<1x!tpu.dma_semaphore, #tpu.memory_space<semaphore_mem>> -> memref<!tpu.dma_semaphore, #tpu.memory_space<semaphore_mem>>
    tpu.enqueue_dma source(%arg3 : memref<128x128xbf16, #tpu.memory_space<any>>) target(%45 : memref<128x128xbf16, #tpu.memory_space<vmem>>) target_semaphore(%47 : memref<!tpu.dma_semaphore, #tpu.memory_space<semaphore_mem>>)
    %c1 = arith.constant 1 : index
    %c0_32 = arith.constant 0 : index
    %c0_33 = arith.constant 0 : index
    %48 = vector.load %arg8[%c1, %c0_32, %c0_33] : memref<2x128x128xbf16, #tpu.memory_space<vmem>>, vector<1x128x128xbf16>
    %49 = vector.shape_cast %48 : vector<1x128x128xbf16> to vector<128x128xbf16>
    %cst_34 = arith.constant dense<0.000000e+00> : vector<8x128xf32>
    %50 = tpu.matmul %39, %49, %cst_34 {dimension_numbers = #tpu.dot_dimension_numbers<[1], [0], [0], [1], [0, 0, 1, 1], [], []>} : vector<8x128xbf16>, vector<128x128xbf16>, vector<8x128xf32> -> vector<8x128xf32>
    %cst_35 = arith.constant dense<0.000000e+00> : vector<128xf32>
    %51 = vector.multi_reduction <add>, %50, %cst_35 [0] : vector<8x128xf32> to vector<128xf32>
    %52 = vector.shape_cast %51 : vector<128xf32> to vector<1x128xf32>
    %cst_36 = arith.constant 8.000000e+00 : f32
    %53 = vector.broadcast %cst_36 : f32 to vector<1x128xf32>
    %54 = arith.divf %52, %53 : vector<1x128xf32>
    %55 = vector.broadcast %54 : vector<1x128xf32> to vector<8x128xf32>
    %56 = arith.subf %50, %55 : vector<8x128xf32>
    %57 = arith.mulf %56, %56 : vector<8x128xf32>
    %cst_37 = arith.constant dense<0.000000e+00> : vector<128xf32>
    %58 = vector.multi_reduction <add>, %57, %cst_37 [0] : vector<8x128xf32> to vector<128xf32>
    %59 = vector.shape_cast %58 : vector<128xf32> to vector<1x128xf32>
    %cst_38 = arith.constant 8.000000e+00 : f32
    %60 = vector.broadcast %cst_38 : f32 to vector<1x128xf32>
    %61 = arith.divf %59, %60 : vector<1x128xf32>
    %c1_39 = arith.constant 1 : index
    %c0_40 = arith.constant 0 : index
    %62 = vector.load %arg4[%c1_39, %c0_40] : memref<2x128xf32, #tpu.memory_space<vmem>>, vector<1x128xf32>
    %c1_41 = arith.constant 1 : index
    %c0_42 = arith.constant 0 : index
    %63 = vector.load %arg5[%c1_41, %c0_42] : memref<2x128xf32, #tpu.memory_space<vmem>>, vector<1x128xf32>
    %cst_43 = arith.constant 9.99999974E-6 : f32
    %64 = vector.broadcast %cst_43 : f32 to vector<1x128xf32>
    %65 = arith.addf %61, %64 : vector<1x128xf32>
    %66 = math.rsqrt %65 : vector<1x128xf32>
    %67 = arith.mulf %62, %66 : vector<1x128xf32>
    %68 = vector.broadcast %67 : vector<1x128xf32> to vector<8x128xf32>
    %69 = arith.mulf %56, %68 : vector<8x128xf32>
    %70 = vector.broadcast %63 : vector<1x128xf32> to vector<8x128xf32>
    %71 = arith.addf %69, %70 : vector<8x128xf32>
    %cst_44 = arith.constant 0.000000e+00 : f32
    %72 = vector.broadcast %cst_44 : f32 to vector<8x128xf32>
    %73 = arith.maximumf %71, %72 : vector<8x128xf32>
    %74 = arith.truncf %73 : vector<8x128xf32> to vector<8x128xbf16>
    %c0_i32_45 = arith.constant 0 : i32
    %c0_i32_46 = arith.constant 0 : i32
    %c0_i32_47 = arith.constant 0 : i32
    %c0_i32_48 = arith.constant 0 : i32
    %75 = tpu.memref_slice %arg8[%c0_i32_45, %c0_i32_47, %c0_i32_48] : memref<2x128x128xbf16, #tpu.memory_space<vmem>> -> memref<1x128x128xbf16, #tpu.memory_space<vmem>>
    %76 = tpu.memref_squeeze %75 : memref<1x128x128xbf16, #tpu.memory_space<vmem>> -> memref<128x128xbf16, #tpu.memory_space<vmem>>
    %77 = tpu.memref_slice %arg9[%c0_i32_46] : memref<2x!tpu.dma_semaphore, #tpu.memory_space<semaphore_mem>> -> memref<1x!tpu.dma_semaphore, #tpu.memory_space<semaphore_mem>>
    %78 = tpu.memref_squeeze %77 : memref<1x!tpu.dma_semaphore, #tpu.memory_space<semaphore_mem>> -> memref<!tpu.dma_semaphore, #tpu.memory_space<semaphore_mem>>
    tpu.wait_dma2 semaphore(%78 : memref<!tpu.dma_semaphore, #tpu.memory_space<semaphore_mem>>) src(%arg3 : memref<128x128xbf16, #tpu.memory_space<any>>) dst(%76 : memref<128x128xbf16, #tpu.memory_space<vmem>>)
    %c0_49 = arith.constant 0 : index
    %c0_50 = arith.constant 0 : index
    %c0_51 = arith.constant 0 : index
    %79 = vector.load %arg8[%c0_49, %c0_50, %c0_51] : memref<2x128x128xbf16, #tpu.memory_space<vmem>>, vector<1x128x128xbf16>
    %80 = vector.shape_cast %79 : vector<1x128x128xbf16> to vector<128x128xbf16>
    %cst_52 = arith.constant dense<0.000000e+00> : vector<8x128xf32>
    %81 = tpu.matmul %74, %80, %cst_52 {dimension_numbers = #tpu.dot_dimension_numbers<[1], [0], [0], [1], [0, 0, 1, 1], [], []>} : vector<8x128xbf16>, vector<128x128xbf16>, vector<8x128xf32> -> vector<8x128xf32>
    %c0_53 = arith.constant 0 : index
    %c0_54 = arith.constant 0 : index
    %82 = vector.load %arg6[%c0_53, %c0_54] : memref<1x128xf32, #tpu.memory_space<vmem>>, vector<1x128xf32>
    %83 = vector.broadcast %82 : vector<1x128xf32> to vector<8x128xf32>
    %84 = arith.addf %81, %83 : vector<8x128xf32>
    %c0_55 = arith.constant 0 : index
    %c0_56 = arith.constant 0 : index
    %85 = vector.load %arg7[%c0_55, %c0_56] : memref<8x128xf32, #tpu.memory_space<vmem>>, vector<8x128xf32>
    tpu.vector_store %arg7[%c0_55, %c0_56], %84 {strides = array<i32>} : memref<8x128xf32, #tpu.memory_space<vmem>>, vector<8x128xf32>,
    return
  }
}

</mosaic_0001>

<bundles_post_ra>
// kernel: mlp_forward.1
= control target key start
LH: loop header
LB: loop body
LE: loop exit
PB: predicated region body
PF: predicated region fallthrough
CT: control target
= control target key end

     0   :  { %12 = vsyncpa [#allocation5], 0  ;;  %s654_s29 = smov [#allocation2]   ;;  %s741_s0 = inlined_call_operand.vmem [shape: bf16[8,128], index: 0, kind: input, shape index: {}]   ;;  %s742_s1 = inlined_call_operand.hbm [shape: bf16[128,128], index: 1, kind: input, shape index: {}]   ;;  %s743_s2 = inlined_call_operand.hbm [shape: bf16[128,128], index: 2, kind: input, shape index: {}]   ;;  %s744_s3 = inlined_call_operand.hbm [shape: bf16[128,128], index: 3, kind: input, shape index: {}]   ;;  %s745_s4 = inlined_call_operand.vmem [shape: f32[2,128], index: 4, kind: input, shape index: {}]   ;;  %s746_s5 = inlined_call_operand.vmem [shape: f32[2,128], index: 5, kind: input, shape index: {}]   ;;  %s747_s6 = inlined_call_operand.vmem [shape: f32[1,128], index: 6, kind: input, shape index: {}]   ;;  %s748_s7 = inlined_call_operand.hbm [shape: f32[8,128], index: 7, kind: output, shape index: {}]  }
   0x1   :  { %s28_s26 = sshll.u32 %s742_s1, 4  ;;  %v34_v0 = vld [vmem:[%s741_s0] sm:$0xf]  ;;  %s704_s30 = sshll.u32 %s654_s29, 4  ;;  %s29_s26 = int_to_ptr.hbm [resolvable:$true] %s28_s26  ;;  %s31_s30 = int_to_ptr.vmem [resolvable:$true] %s704_s30 }
   0x2   :  { %33 = dma.hbm_to_vmem [thread:$0]  %s29_s26, 1024, %s31_s30, [#allocation3] }
   0x3   :  { %646 = dma.done.wait [#allocation3], 1024 }
   0x4   :  { %647 = vsyncadd [#allocation3], 4294966272  ;;  %s48_s10 = sshll.u32 %s743_s2, 4  ;;  %s655_s1 = smov [#allocation2 + $0x40]   ;;  %v656_v9 = vmov 8.0   ;;  %s49_s10 = int_to_ptr.hbm [resolvable:$true] %s48_s10 }
   0x5   :  { %s50_s11 = sshll.u32 %s655_s1, 4  ;;  %542 = vrcp.f32 %v656_v9  ;;  %v154_v40 = vld [vmem:[%s745_s4] sm:$0x1]  ;;  %s51_s11 = int_to_ptr.vmem [resolvable:$true] %s50_s11 }
   0x6   :  { %53 = dma.hbm_to_vmem [thread:$0]  %s49_s10, 1024, %s51_s11, [#allocation3 + $0x1]  ;;  %v541_v45 = vld [vmem:[%s746_s5] ss:$0 sm:$0xff] }
   0x7   :  { %v520_v1 = vld [vmem:[#allocation2 + $0x38] sm:$0xff]  ;;  %v519_v2 = vld [vmem:[#allocation2 + $0x30] sm:$0xff]  ;;  %v518_v3 = vld [vmem:[#allocation2 + $0x28] sm:$0xff] }
   0x8   :  { %118 = vmatpush.bf16.msra.mxu0 %v520_v1  ;;  %v517_v4 = vld [vmem:[#allocation2 + $0x20] sm:$0xff]  ;;  %v516_v5 = vld [vmem:[#allocation2 + $0x18] sm:$0xff]  ;;  %v515_v6 = vld [vmem:[#allocation2 + $0x10] sm:$0xff] }
   0x9   :  { %v514_v7 = vld [vmem:[#allocation2 + $0x8] sm:$0xff]  ;;  %v513_v8 = vld [vmem:[#allocation2] sm:$0xff] }
   0xb   :  { %v543_v10 = vpop.eup %542 }
   0xc   :  { %119 = vmatpush.bf16.msra.mxu0 %v519_v2  ;;  %v138_v11 = vmul.f32 8.0, %v543_v10  ;;  %vm142_vm0 = vweird.f32 %v543_v10 }
   0xe   :  { %v139_v12 = vsub.f32 1.0, %v138_v11 }
  0x10   :  { %120 = vmatpush.bf16.msra.mxu0 %v518_v3  ;;  %v140_v15 = vmul.f32 %v543_v10, %v139_v12 }
  0x12   :  { %v141_v18 = vadd.f32 %v543_v10, %v140_v15 }
  0x14   :  { %121 = vmatpush.bf16.msra.mxu0 %v517_v4  ;;  %v712_v22 = vsel %vm142_vm0, %v543_v10, %v141_v18 }
  0x18   :  { %122 = vmatpush.bf16.msra.mxu0 %v516_v5 }
  0x1c   :  { %123 = vmatpush.bf16.msra.mxu0 %v515_v6 }
  0x20   :  { %124 = vmatpush.bf16.msra.mxu0 %v514_v7 }
  0x24   :  { %125 = vmatpush.bf16.msra.mxu0 %v513_v8 }
  0x27   :  { %126 = vmatmul.bf16.vlgmr.msra.gmra.mxu0 %v34_v0 }
  0xa4   :  { %v127_v13 = vpop.f32.mrf.mxu0 }
  0xa5   :  { %v131_v14 = vrot.slane %v127_v13, 4 }
  0xa7   :  { %v132_v16 = vadd.f32 %v131_v14, %v127_v13 }
  0xa9   :  { %v133_v17 = vrot.slane %v132_v16, 2 }
  0xab   :  { %v134_v19 = vadd.f32 %v133_v17, %v132_v16 }
  0xac   :  { %v129_v20 = vpop.f32.mrf.mxu0 }
  0xad   :  { %v135_v21 = vrot.slane %v134_v19, 1 }
  0xaf   :  { %v136_v23 = vadd.f32 %v135_v21, %v134_v19 }
  0xb1   :  { %v144_v24 = vmul.f32 %v712_v22, %v136_v23 }
  0xb3   :  { %v145_v25 = vsub.f32 %v127_v13, %v144_v24 }
  0xb5   :  { %v146_v26 = vmul.f32 %v145_v25, %v145_v25 }
  0xb7   :  { %v147_v27 = vrot.slane %v146_v26, 4 }
  0xb9   :  { %v148_v28 = vadd.f32 %v147_v27, %v146_v26 }
  0xbb   :  { %v149_v29 = vrot.slane %v148_v28, 2 }
  0xbd   :  { %v150_v30 = vadd.f32 %v149_v29, %v148_v28 }
  0xbf   :  { %v151_v31 = vrot.slane %v150_v30, 1 }
  0xc1   :  { %v152_v32 = vadd.f32 %v151_v31, %v150_v30 }
  0xc3   :  { %v153_v33 = vmul.f32 %v152_v32, %v712_v22 }
  0xc5   :  { %v156_v34 = vadd.f32 1e-05, %v153_v33 }
  0xc7   :  { %544 = vrsqrt.f32 %v156_v34  ;;  %vm163_vm2 = vweird.f32 %v156_v34 }
  0xcd   :  { %v545_v35 = vpop.eup %544 }
  0xce   :  { %v158_v36 = vmul.f32 %v545_v35, %v156_v34  ;;  %vm164_vm1 = vweird.f32 %v545_v35 }
  0xcf   :  { %vm165_vm3 = vmor %vm163_vm2, %vm164_vm1 }
  0xd0   :  { %v159_v37 = vmul.f32 %v545_v35, %v158_v36 }
  0xd2   :  { %v160_v38 = vmul.f32 0.5, %v159_v37 }
  0xd4   :  { %v161_v39 = vsub.f32 1.5, %v160_v38 }
  0xd6   :  { %v162_v41 = vmul.f32 %v545_v35, %v161_v39 }
  0xd8   :  { %v166_v42 = vsel %vm165_vm3, %v545_v35, %v162_v41 }
  0xd9   :  { %v167_v43 = vmul.f32 %v166_v42, %v154_v40 }
  0xdb   :  { %v168_v44 = vperm.slane %v167_v43, 0 }
  0xdd   :  { %v169_v46 = vmul.f32 %v168_v44, %v145_v25 }
  0xdf   :  { %v171_v47 = vadd.f32 %v541_v45, %v169_v46 }
  0xe1   :  { %v172_v48 = vmax.f32 %v171_v47, 0.0 }
  0xe3   :  { %v173_v49 = vpack.c.bf16 %v172_v48, %v172_v48 }
  0xe4   :  { %648 = dma.done.wait [#allocation3 + $0x1], 1024 }
  0xe5   :  { %649 = vsyncadd [#allocation3 + $0x1], 4294966272  ;;  %s183_s16 = sshll.u32 %s744_s3, 4  ;;  %v282_v18 = vld [vmem:[%s745_s4 + $0x1] sm:$0x1]  ;;  %s184_s16 = int_to_ptr.hbm [resolvable:$true] %s183_s16 }
  0xe6   :  { %188 = dma.hbm_to_vmem [thread:$0]  %s184_s16, 1024, %s31_s30, [#allocation3] }
  0xe7   :  { %v528_v50 = vld [vmem:[#allocation2 + $0x78] sm:$0xff]  ;;  %v527_v51 = vld [vmem:[#allocation2 + $0x70] sm:$0xff]  ;;  %v526_v52 = vld [vmem:[#allocation2 + $0x68] sm:$0xff] }
  0xe8   :  { %253 = vmatpush.bf16.msra.mxu1 %v528_v50  ;;  %v525_v53 = vld [vmem:[#allocation2 + $0x60] sm:$0xff]  ;;  %v524_v54 = vld [vmem:[#allocation2 + $0x58] sm:$0xff]  ;;  %v523_v55 = vld [vmem:[#allocation2 + $0x50] sm:$0xff] }
  0xe9   :  { %v522_v56 = vld [vmem:[#allocation2 + $0x48] sm:$0xff]  ;;  %v521_v57 = vld [vmem:[#allocation2 + $0x40] sm:$0xff] }
  0xec   :  { %254 = vmatpush.bf16.msra.mxu1 %v527_v51 }
  0xf0   :  { %255 = vmatpush.bf16.msra.mxu1 %v526_v52 }
  0xf4   :  { %256 = vmatpush.bf16.msra.mxu1 %v525_v53 }
  0xf8   :  { %257 = vmatpush.bf16.msra.mxu1 %v524_v54 }
  0xfc   :  { %258 = vmatpush.bf16.msra.mxu1 %v523_v55 }
 0x100   :  { %259 = vmatpush.bf16.msra.mxu1 %v522_v56 }
 0x104   :  { %260 = vmatpush.bf16.msra.mxu1 %v521_v57 }
 0x107   :  { %261 = vmatmul.bf16.vlgmr.msra.gmra.mxu1 %v173_v49 }
 0x184   :  { %v262_v58 = vpop.f32.mrf.mxu1 }
 0x185   :  { %v266_v59 = vrot.slane %v262_v58, 4 }
 0x187   :  { %v267_v60 = vadd.f32 %v266_v59, %v262_v58 }
 0x189   :  { %v268_v61 = vrot.slane %v267_v60, 2 }
 0x18b   :  { %v269_v62 = vadd.f32 %v268_v61, %v267_v60 }
 0x18c   :  { %v264_v63 = vpop.f32.mrf.mxu1 }
 0x18d   :  { %v270_v0 = vrot.slane %v269_v62, 1 }
 0x18f   :  { %v271_v1 = vadd.f32 %v270_v0, %v269_v62 }
 0x191   :  { %v272_v2 = vmul.f32 %v271_v1, %v712_v22 }
 0x193   :  { %v273_v3 = vsub.f32 %v262_v58, %v272_v2 }
 0x195   :  { %v274_v4 = vmul.f32 %v273_v3, %v273_v3 }
 0x197   :  { %v275_v5 = vrot.slane %v274_v4, 4 }
 0x199   :  { %v276_v6 = vadd.f32 %v275_v5, %v274_v4 }
 0x19b   :  { %v277_v7 = vrot.slane %v276_v6, 2 }
 0x19d   :  { %v278_v8 = vadd.f32 %v277_v7, %v276_v6 }
 0x19f   :  { %v279_v9 = vrot.slane %v278_v8, 1 }
 0x1a1   :  { %v280_v10 = vadd.f32 %v279_v9, %v278_v8 }
 0x1a3   :  { %v281_v11 = vmul.f32 %v280_v10, %v712_v22  ;;  %v546_v22 = vld [vmem:[%s746_s5 + $0x1] ss:$0 sm:$0xff] }
 0x1a5   :  { %v284_v12 = vadd.f32 1e-05, %v281_v11 }
 0x1a7   :  { %547 = vrsqrt.f32 %v284_v12  ;;  %vm291_vm5 = vweird.f32 %v284_v12 }
 0x1ad   :  { %v548_v13 = vpop.eup %547 }
 0x1ae   :  { %v286_v14 = vmul.f32 %v548_v13, %v284_v12  ;;  %vm292_vm4 = vweird.f32 %v548_v13 }
 0x1af   :  { %vm293_vm6 = vmor %vm291_vm5, %vm292_vm4 }
 0x1b0   :  { %v287_v15 = vmul.f32 %v548_v13, %v286_v14 }
 0x1b2   :  { %v288_v16 = vmul.f32 0.5, %v287_v15 }
 0x1b4   :  { %v289_v17 = vsub.f32 1.5, %v288_v16 }
 0x1b6   :  { %v290_v19 = vmul.f32 %v548_v13, %v289_v17 }
 0x1b8   :  { %v294_v20 = vsel %vm293_vm6, %v548_v13, %v290_v19 }
 0x1b9   :  { %v295_v21 = vmul.f32 %v294_v20, %v282_v18 }
 0x1bb   :  { %v296_v23 = vperm.slane %v295_v21, 0 }
 0x1bd   :  { %v297_v24 = vmul.f32 %v296_v23, %v273_v3 }
 0x1bf   :  { %v299_v25 = vadd.f32 %v546_v22, %v297_v24 }
 0x1c1   :  { %v300_v26 = vmax.f32 %v299_v25, 0.0 }
 0x1c3   :  { %v301_v27 = vpack.c.bf16 %v300_v26, %v300_v26 }
 0x1c4   :  { %650 = dma.done.wait [#allocation3], 1024 }
 0x1c5   :  { %651 = vsyncadd [#allocation3], 4294966272  ;;  %v536_v28 = vld [vmem:[#allocation2 + $0x38] sm:$0xff]  ;;  %v535_v29 = vld [vmem:[#allocation2 + $0x30] sm:$0xff]  ;;  %s657_s20 = smov [#allocation4]   ;;  %s393_s24 = sshll.u32 %s748_s7, 4  ;;  %s394_s24 = int_to_ptr.hbm [resolvable:$true] %s393_s24 }
 0x1c6   :  { %372 = vmatpush.bf16.msra.mxu2 %v536_v28  ;;  %v534_v30 = vld [vmem:[#allocation2 + $0x28] sm:$0xff]  ;;  %v533_v31 = vld [vmem:[#allocation2 + $0x20] sm:$0xff]  ;;  %v532_v32 = vld [vmem:[#allocation2 + $0x18] sm:$0xff]  ;;  %s391_s21 = sshll.u32 %s657_s20, 4  ;;  %s392_s21 = int_to_ptr.vmem [resolvable:$true] %s391_s21 }
 0x1c7   :  { %v531_v33 = vld [vmem:[#allocation2 + $0x10] sm:$0xff]  ;;  %v530_v34 = vld [vmem:[#allocation2 + $0x8] sm:$0xff]  ;;  %v529_v35 = vld [vmem:[#allocation2] sm:$0xff] }
 0x1c8   :  { %v549_v36 = vld [vmem:[%s747_s6] ss:$0 sm:$0xff] }
 0x1ca   :  { %373 = vmatpush.bf16.msra.mxu2 %v535_v29 }
 0x1ce   :  { %374 = vmatpush.bf16.msra.mxu2 %v534_v30 }
 0x1d2   :  { %375 = vmatpush.bf16.msra.mxu2 %v533_v31 }
 0x1d6   :  { %376 = vmatpush.bf16.msra.mxu2 %v532_v32 }
 0x1da   :  { %377 = vmatpush.bf16.msra.mxu2 %v531_v33 }
 0x1de   :  { %378 = vmatpush.bf16.msra.mxu2 %v530_v34 }
 0x1e2   :  { %379 = vmatpush.bf16.msra.mxu2 %v529_v35 }
 0x1e5   :  { %380 = vmatmul.bf16.vlgmr.msra.gmra.mxu2 %v301_v27 }
 0x268   :  { %v381_v37 = vpop.f32.mrf.mxu2 }
 0x269   :  { %v382_v38 = vadd.f32 %v549_v36, %v381_v37 }
 0x26b   :  { %385 = vst [vmem:[#allocation4] sm:$0xff] %v382_v38 }
 0x26c   :  { %396 = dma.vmem_to_hbm [thread:$0]  %s392_s21, 128, %s394_s24, [#allocation5]  }
 0x270   :  { %v383_v39 = vpop.f32.mrf.mxu2 }
 0x271   :  { %652 = dma.done.wait [#allocation5], 128  }
 0x272   :  { %653 = vsyncadd [#allocation5], 4294967168 }
 0x273   :  { %401 = vsyncpa [#allocation5], 1 }
 0x274   :  { %402 = vsyncmov [#allocation3] }
 0x277   :  { %s403_s25 = vpop.sfrf %402 }
 0x278   :  { %p511_p0 = scmp.ne.s32.totalorder %s403_s25, 0 }
 0x27a   :  { %407 = shalt.err (%p511_p0)  }
 0x27b   :  { %409 = vsyncmov [#allocation3 + $0x1] }
 0x27e   :  { %s410_s6 = vpop.sfrf %409 }
 0x27f   :  { %p512_p1 = scmp.ne.s32.totalorder %s410_s6, 0 }
 0x281   :  { %414 = shalt.err (%p512_p1)  }

</bundles_post_ra>
